<compile_context>
chip_gen: v7x
topology: tpu7x:2x2x1
jax: 0.10.0
libtpu: 0.0.40
codegen_flags: <defaults>
</compile_context>

<pallas_src>
import functools

import numpy as np

import jax
import jax.numpy as jnp
from jax.experimental import pallas as pl
from jax.experimental.pallas import tpu as pltpu


def _cdiv(a, b):
    return -(-a // b)


def _ssim_kernel(x_ref, y_ref, wc_ref, ra_ref, rb_ref, out_ref, *, use_mxu, A1, A2):
    """One grid step over TN packed groups.

    x_ref / y_ref : (1, M, Wl) with M = TN*H, Wl = G*W (unpadded data).
    wc_ref        : (Wl, Wl) reflect+3tap band matrix  (MXU path), or
                    (2, Wl)  lane reflect coefficients (VPU fallback).
    ra_ref/rb_ref : (M, 1) per-row reflect coefficients for the H direction.
    out_ref       : (1, 1, Wl) partial sums of clamp((1-SSIM)/2, 0, 1).
    """
    x = x_ref[0].astype(jnp.float32)          # (M, Wl)
    y = y_ref[0].astype(jnp.float32)
    ra = ra_ref[...]                          # (M, 1)
    rb = rb_ref[...]
    M = x.shape[0]

    if use_mxu:
        band = wc_ref[...]                    # (Wl, Wl), entries {0,1,2}

        def lane_pool(q):
            # Reflect-pad + 3-tap sum along lanes as a banded matmul on the
            # (otherwise idle) MXU.  0/1/2 weights are exact; any bf16 pass
            # rounding on the data stays far inside the test tolerance.
            return jnp.dot(q, band, preferred_element_type=jnp.float32)
    else:
        ca = wc_ref[0:1, :]                   # (1, Wl)
        cb = wc_ref[1:2, :]
        Wl = x.shape[1]

        def lane_pool(q):
            # VPU/XLU fallback for very wide rows (band matmul would waste MXU).
            return (ca * pltpu.roll(q, 1, axis=1) + q
                    + cb * pltpu.roll(q, Wl - 1, axis=1))

    def pool9(q):
        # Separable 3x3 reflect-padded SUM (scale 1/9 folded into the rational).
        rw = lane_pool(q)
        # H direction: coefficient-weighted rolls; group-boundary and wrap rows
        # are killed by the zero coefficients, reflection rows get weight 2.
        return ra * pltpu.roll(rw, 1, axis=0) + rw + rb * pltpu.roll(rw, M - 1, axis=0)

    px = pool9(x)
    py = pool9(y)
    pxy = pool9(x * y)
    p2 = pool9(x * x + y * y)                 # fused pool of x^2 and y^2

    pxpy = px * py
    pp = px * px + py * py
    # SSIM with the 1/9 pooling scale folded in (A1 = 81*C1, A2 = 81*C2):
    n = (2.0 * pxpy + A1) * (18.0 * pxy - 2.0 * pxpy + A2)
    d = (pp + A1) * (9.0 * p2 - pp + A2)      # >= A1*A2 > 0 -> approx recip safe
    val = jnp.clip(0.5 - 0.5 * n * pl.reciprocal(d, approx=True), 0.0, 1.0)

    # Reduce over rows in-kernel -> one lane-dense partial row per block.
    out_ref[0] = jnp.sum(val, axis=0, keepdims=True)


def ssim_loss(x, y):
    """x, y: (B, C, H, W) NCHW, same semantics as the PyTorch SSIMLoss.forward.

    Returns the scalar 1 - mean(clamp((1 - SSIM) / 2, 0, 1)).
    """
    B, C, H, W = x.shape
    assert y.shape == x.shape
    assert H >= 2 and W >= 2, "ReflectionPad2d(1) requires H, W >= 2"
    N = B * C
    C1, C2 = 0.01 ** 2, 0.03 ** 2
    A1, A2 = 81.0 * C1, 81.0 * C2

    # --- Lane packing: G unpadded slices side by side along the lane axis. ---
    G = min(N, max(1, 128 // W)) if W < 128 else 1
    Wl = G * W
    NG = _cdiv(N, G)
    use_mxu = Wl <= 256   # keep the band-matmul contraction MXU-friendly

    # --- Generation-aware VMEM sizing. ---------------------------------------
    try:
        vmem_cap = int(pltpu.get_tpu_info().vmem_capacity_bytes)
    except Exception:
        vmem_cap = 64 * 1024 * 1024        # conservative: v7x per-TensorCore
    budget = max(8 << 20, int(vmem_cap * 0.30))
    vmem_limit = int(min(int(vmem_cap * 0.75), 100 << 20))

    # (8,128)-padded footprint per group: 2 inputs x 2 pipeline buffers plus
    # ~12 live f32 (M, Wl) intermediates in the hot loop.
    Wlpad = _cdiv(Wl, 128) * 128
    itemsize = jnp.dtype(x.dtype).itemsize
    per_group = H * Wlpad * (4 * itemsize + 12 * 4)
    TN = int(max(1, min(NG, budget // max(per_group, 1))))
    # Keep >= 2 blocks on the "parallel" axis whenever possible (v7x: 2 TCs).
    TN = min(TN, max(1, _cdiv(NG, 2)))
    num_blocks = _cdiv(NG, TN)
    M = TN * H
    # TODO(synk): for very large H*W add a second grid axis that tiles H with a
    # 2-row halo so one (M, Wl) slab always fits v7x's 64 MiB VMEM.

    # --- Host-side packing (single transpose copy; a pure reshape when G==1). -
    xs = x.reshape(N, H, W)
    ys = y.reshape(N, H, W)
    n_pad = num_blocks * TN * G - N
    if n_pad:
        z = jnp.zeros((n_pad, H, W), xs.dtype)
        xs = jnp.concatenate([xs, z], axis=0)
        ys = jnp.concatenate([ys, z], axis=0)

    def pack(a):
        a = a.reshape(num_blocks, TN, G, H, W).transpose(0, 1, 3, 2, 4)
        return a.reshape(num_blocks, M, Wl)

    xs, ys = pack(xs), pack(ys)
    # TODO(synk): fuse this packing transpose into the kernel via manual DMA
    # (memory_space=pl.ANY) to remove the last prep HBM pass for small W (v5e).

    # --- Constant pooling coefficients (reflection pad folded in). -----------
    if use_mxu:
        wc = np.zeros((Wl, Wl), np.float32)
        for g in range(G):
            for j in range(W):
                for dj in (-1, 0, 1):
                    s = j + dj
                    if s == -1:
                        s = 1
                    elif s == W:
                        s = W - 2
                    wc[g * W + s, g * W + j] += 1.0
        wc_block = (Wl, Wl)
    else:
        wc = np.ones((2, Wl), np.float32)
        for g in range(G):
            wc[0, g * W] = 0.0
            wc[1, g * W] = 2.0
            wc[0, g * W + W - 1] = 2.0
            wc[1, g * W + W - 1] = 0.0
        wc_block = (2, Wl)

    ra = np.ones((M, 1), np.float32)
    rb = np.ones((M, 1), np.float32)
    for t in range(TN):
        ra[t * H, 0] = 0.0
        rb[t * H, 0] = 2.0
        ra[t * H + H - 1, 0] = 2.0
        rb[t * H + H - 1, 0] = 0.0

    wc = jnp.asarray(wc)
    ra = jnp.asarray(ra)
    rb = jnp.asarray(rb)

    kernel = functools.partial(_ssim_kernel, use_mxu=use_mxu, A1=A1, A2=A2)

    partials = pl.pallas_call(
        kernel,
        out_shape=jax.ShapeDtypeStruct((num_blocks, 1, Wl), jnp.float32),
        grid_spec=pltpu.PrefetchScalarGridSpec(
            num_scalar_prefetch=0,
            grid=(num_blocks,),
            in_specs=[
                pl.BlockSpec((1, M, Wl), lambda i: (i, 0, 0)),
                pl.BlockSpec((1, M, Wl), lambda i: (i, 0, 0)),
                pl.BlockSpec(wc_block, lambda i: (0, 0)),
                pl.BlockSpec((M, 1), lambda i: (0, 0)),
                pl.BlockSpec((M, 1), lambda i: (0, 0)),
            ],
            out_specs=pl.BlockSpec((1, 1, Wl), lambda i: (i, 0, 0)),
        ),
        compiler_params=pltpu.CompilerParams(
            dimension_semantics=("parallel",),
            vmem_limit_bytes=vmem_limit,
        ),
        # NOTE: if a v5e trace ever shows exposed DMA, add
        # pipeline_mode=pl.Buffered(3) on the two input BlockSpecs.
    )(xs, ys, wc, ra, rb)

    count = float(N * H * W)
    return 1.0 - jnp.sum(partials) / count


def _ssim_loss_ref(x, y):
    """Pure-JAX reference mirroring the PyTorch module exactly."""
    C1, C2 = 0.01 ** 2, 0.03 ** 2
    H, W = x.shape[2], x.shape[3]
    pad = ((0, 0), (0, 0), (1, 1), (1, 1))
    xp = jnp.pad(x, pad, mode="reflect").astype(jnp.float32)
    yp = jnp.pad(y, pad, mode="reflect").astype(jnp.float32)

    def pool(a):
        s = jnp.zeros(a[:, :, 0:H, 0:W].shape, jnp.float32)
        for di in range(3):
            for dj in range(3):
                s = s + a[:, :, di:di + H, dj:dj + W]
        return s / 9.0

    mu_x, mu_y = pool(xp), pool(yp)
    sigma_x = pool(xp * xp) - mu_x ** 2
    sigma_y = pool(yp * yp) - mu_y ** 2
    sigma_xy = pool(xp * yp) - mu_x * mu_y
    n = (2.0 * mu_x * mu_y + C1) * (2.0 * sigma_xy + C2)
    d = (mu_x ** 2 + mu_y ** 2 + C1) * (sigma_x + sigma_y + C2)
    return 1.0 - jnp.mean(jnp.clip((1.0 - n / d) / 2.0, 0.0, 1.0))


if __name__ == "__main__":
    key = jax.random.PRNGKey(0)
    k1, k2 = jax.random.split(key)
    # Small NCHW shapes consistent with the module's forward.
    x = jax.random.uniform(k1, (2, 4, 16, 16), dtype=jnp.float32)
    y = jax.random.uniform(k2, (2, 4, 16, 16), dtype=jnp.float32)

    loss = ssim_loss(x, y)
    jax.block_until_ready(loss)

    ref = _ssim_loss_ref(x, y)
    err = float(jnp.abs(loss - ref))
    assert err < 2e-2, f"mismatch vs reference: kernel={float(loss)} ref={float(ref)} err={err}"
    print("KERNEL_OK")
</pallas_src>

<mosaic_0001>
module attributes {stable_mosaic.version = 11 : i64} {
  func.func @_ssim_kernel(%arg0: i32, %arg1: memref<1x16x128xf32, #tpu.memory_space<vmem>>, %arg2: memref<1x16x128xf32, #tpu.memory_space<vmem>>, %arg3: memref<128x128xf32, #tpu.memory_space<vmem>>, %arg4: memref<16x1xf32, #tpu.memory_space<vmem>>, %arg5: memref<16x1xf32, #tpu.memory_space<vmem>>, %arg6: memref<1x1x128xf32, #tpu.memory_space<vmem>>) attributes {dimension_semantics = [#tpu.dimension_semantics<parallel>], iteration_bounds = array<i64: 1>, scalar_prefetch = 0 : i64, scratch_operands = 0 : i64, tpu.core_type = #tpu.core_type<tc>, window_params = [{transform_indices = @transform_0, window_bounds = array<i64: 1, 16, 128>}, {transform_indices = @transform_1, window_bounds = array<i64: 1, 16, 128>}, {pipeline_mode = #tpu.pipeline_mode<synchronous>, transform_indices = @transform_2, window_bounds = array<i64: 128, 128>}, {pipeline_mode = #tpu.pipeline_mode<synchronous>, transform_indices = @transform_3, window_bounds = array<i64: 16, 1>}, {pipeline_mode = #tpu.pipeline_mode<synchronous>, transform_indices = @transform_4, window_bounds = array<i64: 16, 1>}, {transform_indices = @transform_5, window_bounds = array<i64: 1, 1, 128>}]} {
    %c0 = arith.constant 0 : index
    %c0_0 = arith.constant 0 : index
    %c0_1 = arith.constant 0 : index
    %0 = vector.load %arg1[%c0, %c0_0, %c0_1] : memref<1x16x128xf32, #tpu.memory_space<vmem>>, vector<1x16x128xf32>
    %1 = vector.shape_cast %0 : vector<1x16x128xf32> to vector<16x128xf32>
    %c0_2 = arith.constant 0 : index
    %c0_3 = arith.constant 0 : index
    %c0_4 = arith.constant 0 : index
    %2 = vector.load %arg2[%c0_2, %c0_3, %c0_4] : memref<1x16x128xf32, #tpu.memory_space<vmem>>, vector<1x16x128xf32>
    %3 = vector.shape_cast %2 : vector<1x16x128xf32> to vector<16x128xf32>
    %c0_5 = arith.constant 0 : index
    %c0_6 = arith.constant 0 : index
    %4 = vector.load %arg4[%c0_5, %c0_6] : memref<16x1xf32, #tpu.memory_space<vmem>>, vector<16x1xf32>
    %c0_7 = arith.constant 0 : index
    %c0_8 = arith.constant 0 : index
    %5 = vector.load %arg5[%c0_7, %c0_8] : memref<16x1xf32, #tpu.memory_space<vmem>>, vector<16x1xf32>
    %c0_9 = arith.constant 0 : index
    %c0_10 = arith.constant 0 : index
    %6 = vector.load %arg3[%c0_9, %c0_10] : memref<128x128xf32, #tpu.memory_space<vmem>>, vector<128x128xf32>
    %cst = arith.constant dense<0.000000e+00> : vector<16x128xf32>
    %7 = tpu.matmul %1, %6, %cst {dimension_numbers = #tpu.dot_dimension_numbers<[1], [0], [0], [1], [0, 0, 1, 1], [], []>} : vector<16x128xf32>, vector<128x128xf32>, vector<16x128xf32> -> vector<16x128xf32>
    %c1_i32 = arith.constant 1 : i32
    %8 = tpu.dynamic_rotate %7 by %c1_i32 dim 0 : vector<16x128xf32>, i32 -> vector<16x128xf32>
    %9 = vector.broadcast %4 : vector<16x1xf32> to vector<16x128xf32>
    %10 = arith.mulf %9, %8 : vector<16x128xf32>
    %11 = arith.addf %10, %7 : vector<16x128xf32>
    %c15_i32 = arith.constant 15 : i32
    %12 = tpu.dynamic_rotate %7 by %c15_i32 dim 0 : vector<16x128xf32>, i32 -> vector<16x128xf32>
    %13 = vector.broadcast %5 : vector<16x1xf32> to vector<16x128xf32>
    %14 = arith.mulf %13, %12 : vector<16x128xf32>
    %15 = arith.addf %11, %14 : vector<16x128xf32>
    %cst_11 = arith.constant dense<0.000000e+00> : vector<16x128xf32>
    %16 = tpu.matmul %3, %6, %cst_11 {dimension_numbers = #tpu.dot_dimension_numbers<[1], [0], [0], [1], [0, 0, 1, 1], [], []>} : vector<16x128xf32>, vector<128x128xf32>, vector<16x128xf32> -> vector<16x128xf32>
    %c1_i32_12 = arith.constant 1 : i32
    %17 = tpu.dynamic_rotate %16 by %c1_i32_12 dim 0 : vector<16x128xf32>, i32 -> vector<16x128xf32>
    %18 = vector.broadcast %4 : vector<16x1xf32> to vector<16x128xf32>
    %19 = arith.mulf %18, %17 : vector<16x128xf32>
    %20 = arith.addf %19, %16 : vector<16x128xf32>
    %c15_i32_13 = arith.constant 15 : i32
    %21 = tpu.dynamic_rotate %16 by %c15_i32_13 dim 0 : vector<16x128xf32>, i32 -> vector<16x128xf32>
    %22 = vector.broadcast %5 : vector<16x1xf32> to vector<16x128xf32>
    %23 = arith.mulf %22, %21 : vector<16x128xf32>
    %24 = arith.addf %20, %23 : vector<16x128xf32>
    %25 = arith.mulf %1, %3 : vector<16x128xf32>
    %cst_14 = arith.constant dense<0.000000e+00> : vector<16x128xf32>
    %26 = tpu.matmul %25, %6, %cst_14 {dimension_numbers = #tpu.dot_dimension_numbers<[1], [0], [0], [1], [0, 0, 1, 1], [], []>} : vector<16x128xf32>, vector<128x128xf32>, vector<16x128xf32> -> vector<16x128xf32>
    %c1_i32_15 = arith.constant 1 : i32
    %27 = tpu.dynamic_rotate %26 by %c1_i32_15 dim 0 : vector<16x128xf32>, i32 -> vector<16x128xf32>
    %28 = vector.broadcast %4 : vector<16x1xf32> to vector<16x128xf32>
    %29 = arith.mulf %28, %27 : vector<16x128xf32>
    %30 = arith.addf %29, %26 : vector<16x128xf32>
    %c15_i32_16 = arith.constant 15 : i32
    %31 = tpu.dynamic_rotate %26 by %c15_i32_16 dim 0 : vector<16x128xf32>, i32 -> vector<16x128xf32>
    %32 = vector.broadcast %5 : vector<16x1xf32> to vector<16x128xf32>
    %33 = arith.mulf %32, %31 : vector<16x128xf32>
    %34 = arith.addf %30, %33 : vector<16x128xf32>
    %35 = arith.mulf %1, %1 : vector<16x128xf32>
    %36 = arith.mulf %3, %3 : vector<16x128xf32>
    %37 = arith.addf %35, %36 : vector<16x128xf32>
    %cst_17 = arith.constant dense<0.000000e+00> : vector<16x128xf32>
    %38 = tpu.matmul %37, %6, %cst_17 {dimension_numbers = #tpu.dot_dimension_numbers<[1], [0], [0], [1], [0, 0, 1, 1], [], []>} : vector<16x128xf32>, vector<128x128xf32>, vector<16x128xf32> -> vector<16x128xf32>
    %c1_i32_18 = arith.constant 1 : i32
    %39 = tpu.dynamic_rotate %38 by %c1_i32_18 dim 0 : vector<16x128xf32>, i32 -> vector<16x128xf32>
    %40 = vector.broadcast %4 : vector<16x1xf32> to vector<16x128xf32>
    %41 = arith.mulf %40, %39 : vector<16x128xf32>
    %42 = arith.addf %41, %38 : vector<16x128xf32>
    %c15_i32_19 = arith.constant 15 : i32
    %43 = tpu.dynamic_rotate %38 by %c15_i32_19 dim 0 : vector<16x128xf32>, i32 -> vector<16x128xf32>
    %44 = vector.broadcast %5 : vector<16x1xf32> to vector<16x128xf32>
    %45 = arith.mulf %44, %43 : vector<16x128xf32>
    %46 = arith.addf %42, %45 : vector<16x128xf32>
    %47 = arith.mulf %15, %24 : vector<16x128xf32>
    %48 = arith.mulf %15, %15 : vector<16x128xf32>
    %49 = arith.mulf %24, %24 : vector<16x128xf32>
    %50 = arith.addf %48, %49 : vector<16x128xf32>
    %cst_20 = arith.constant 2.000000e+00 : f32
    %51 = vector.broadcast %cst_20 : f32 to vector<16x128xf32>
    %52 = arith.mulf %51, %47 : vector<16x128xf32>
    %cst_21 = arith.constant 8.100000e-03 : f32
    %53 = vector.broadcast %cst_21 : f32 to vector<16x128xf32>
    %54 = arith.addf %52, %53 : vector<16x128xf32>
    %cst_22 = arith.constant 1.800000e+01 : f32
    %55 = vector.broadcast %cst_22 : f32 to vector<16x128xf32>
    %56 = arith.mulf %55, %34 : vector<16x128xf32>
    %cst_23 = arith.constant 2.000000e+00 : f32
    %57 = vector.broadcast %cst_23 : f32 to vector<16x128xf32>
    %58 = arith.mulf %57, %47 : vector<16x128xf32>
    %59 = arith.subf %56, %58 : vector<16x128xf32>
    %cst_24 = arith.constant 7.290000e-02 : f32
    %60 = vector.broadcast %cst_24 : f32 to vector<16x128xf32>
    %61 = arith.addf %59, %60 : vector<16x128xf32>
    %62 = arith.mulf %54, %61 : vector<16x128xf32>
    %cst_25 = arith.constant 8.100000e-03 : f32
    %63 = vector.broadcast %cst_25 : f32 to vector<16x128xf32>
    %64 = arith.addf %50, %63 : vector<16x128xf32>
    %cst_26 = arith.constant 9.000000e+00 : f32
    %65 = vector.broadcast %cst_26 : f32 to vector<16x128xf32>
    %66 = arith.mulf %65, %46 : vector<16x128xf32>
    %67 = arith.subf %66, %50 : vector<16x128xf32>
    %cst_27 = arith.constant 7.290000e-02 : f32
    %68 = vector.broadcast %cst_27 : f32 to vector<16x128xf32>
    %69 = arith.addf %67, %68 : vector<16x128xf32>
    %70 = arith.mulf %64, %69 : vector<16x128xf32>
    %cst_28 = arith.constant 5.000000e-01 : f32
    %71 = vector.broadcast %cst_28 : f32 to vector<16x128xf32>
    %72 = arith.mulf %71, %62 : vector<16x128xf32>
    %73 = tpu.reciprocal %70 {approx = true} : vector<16x128xf32> -> vector<16x128xf32>
    %74 = arith.mulf %72, %73 : vector<16x128xf32>
    %cst_29 = arith.constant 5.000000e-01 : f32
    %75 = vector.broadcast %cst_29 : f32 to vector<16x128xf32>
    %76 = arith.subf %75, %74 : vector<16x128xf32>
    %cst_30 = arith.constant 0.000000e+00 : f32
    %cst_31 = arith.constant 1.000000e+00 : f32
    %77 = vector.broadcast %cst_30 : f32 to vector<16x128xf32>
    %78 = arith.maximumf %77, %76 : vector<16x128xf32>
    %79 = vector.broadcast %cst_31 : f32 to vector<16x128xf32>
    %80 = arith.minimumf %79, %78 : vector<16x128xf32>
    %cst_32 = arith.constant dense<0.000000e+00> : vector<128xf32>
    %81 = vector.multi_reduction <add>, %80, %cst_32 [0] : vector<16x128xf32> to vector<128xf32>
    %82 = vector.shape_cast %81 : vector<128xf32> to vector<1x128xf32>
    %c0_33 = arith.constant 0 : index
    %c0_34 = arith.constant 0 : index
    %c0_35 = arith.constant 0 : index
    %83 = vector.load %arg6[%c0_33, %c0_34, %c0_35] : memref<1x1x128xf32, #tpu.memory_space<vmem>>, vector<1x1x128xf32>
    %84 = vector.shape_cast %83 : vector<1x1x128xf32> to vector<1x128xf32>
    %85 = vector.shape_cast %82 : vector<1x128xf32> to vector<1x1x128xf32>
    tpu.vector_store %arg6[%c0_33, %c0_34, %c0_35], %85 {strides = array<i32>} : memref<1x1x128xf32, #tpu.memory_space<vmem>>, vector<1x1x128xf32>,
    return
  }
  func.func @transform_0(%arg0: i32) -> (i32, i32, i32) {
    %c0_i32 = arith.constant 0 : i32
    %c0_i32_0 = arith.constant 0 : i32
    %c0_i32_1 = arith.constant 0 : i32
    return %arg0, %c0_i32, %c0_i32_0 : i32, i32, i32
  }
  func.func @transform_1(%arg0: i32) -> (i32, i32, i32) {
    %c0_i32 = arith.constant 0 : i32
    %c0_i32_0 = arith.constant 0 : i32
    %c0_i32_1 = arith.constant 0 : i32
    return %arg0, %c0_i32, %c0_i32_0 : i32, i32, i32
  }
  func.func @transform_2(%arg0: i32) -> (i32, i32) {
    %c0_i32 = arith.constant 0 : i32
    %c0_i32_0 = arith.constant 0 : i32
    %c0_i32_1 = arith.constant 0 : i32
    return %c0_i32, %c0_i32_0 : i32, i32
  }
  func.func @transform_3(%arg0: i32) -> (i32, i32) {
    %c0_i32 = arith.constant 0 : i32
    %c0_i32_0 = arith.constant 0 : i32
    %c0_i32_1 = arith.constant 0 : i32
    return %c0_i32, %c0_i32_0 : i32, i32
  }
  func.func @transform_4(%arg0: i32) -> (i32, i32) {
    %c0_i32 = arith.constant 0 : i32
    %c0_i32_0 = arith.constant 0 : i32
    %c0_i32_1 = arith.constant 0 : i32
    return %c0_i32, %c0_i32_0 : i32, i32
  }
  func.func @transform_5(%arg0: i32) -> (i32, i32, i32) {
    %c0_i32 = arith.constant 0 : i32
    %c0_i32_0 = arith.constant 0 : i32
    %c0_i32_1 = arith.constant 0 : i32
    return %arg0, %c0_i32, %c0_i32_0 : i32, i32, i32
  }
}

</mosaic_0001>

<bundles_post_ra>
// kernel: tpu_custom_call.1
= control target key start
LH: loop header
LB: loop body
LE: loop exit
PB: predicated region body
PF: predicated region fallthrough
CT: control target
= control target key end

     0   :  { %10 = vsyncpa [#allocation3], 0  ;;  %s1090_s0 = inlined_call_operand.vmem [shape: f32[1,16,128], index: 0, kind: input, shape index: {}]   ;;  %s1091_s1 = inlined_call_operand.vmem [shape: f32[1,16,128], index: 1, kind: input, shape index: {}]   ;;  %s1092_s2 = inlined_call_operand.hbm [shape: f32[128,128], index: 2, kind: input, shape index: {}]   ;;  %s1093_s3 = inlined_call_operand.vmem [shape: f32[16,1], index: 3, kind: input, shape index: {}]   ;;  %s1094_s4 = inlined_call_operand.vmem [shape: f32[16,1], index: 4, kind: input, shape index: {}]   ;;  %s1095_s5 = inlined_call_operand.hbm [shape: f32[1,1,128], index: 5, kind: output, shape index: {}]  }
   0x1   :  { %11 = vsyncpa [#allocation4], 0  ;;  %s919_s18 = smov [#allocation2]   ;;  %s871_s22 = scalar_lea.hbm %s1092_s2, 2048 }
   0x2   :  { %s21_s19 = sshll.u32 %s919_s18, 4  ;;  %p872_p0 = scmp.ne.s32.totalorder %s1092_s2, %s871_s22  ;;  %s22_s19 = int_to_ptr.vmem [resolvable:$true] %s21_s19 }
   0x3   :  { %p875_p1 = scmp.lt.u32.totalorder %s871_s22, %s1092_s2 }
   0x5   :  { %p877_p2 = pnand %p875_p1, %p872_p0 }
   0x7   :  { %880 = shalt.err (!%p877_p2)
}
   0x8   :  { %s881_s27 = scalar_lea.vmem %s22_s19, 2048  ;;  %p886_p4 = scmp.lt.s32.totalorder %s22_s19, %s22_s19 }
   0x9   :  { %p882_p3 = scmp.ne.s32.totalorder %s22_s19, %s881_s27  ;;  %p887_p5 = scmp.lt.s32.totalorder %s881_s27, %s881_s27 }
   0xb   :  { %p888_p6 = por %p887_p5, %p886_p4 }
   0xd   :  { %p889_p7 = pnand %p888_p6, %p882_p3 }
   0xf   :  { %892 = shalt.err (!%p889_p7)
}
  0x10   :  { %s920_s28 = smov 128   ;;  %s921_s29 = smov 8  }
  0x11   :  { %27 = dma.hbm_to_vmem [thread:$0]  %s1092_s2, 2048, %s22_s19, [#allocation3], %s920_s28, %s920_s28, %s921_s29  }
  0x12   :  { %915 = dma.done.wait [#allocation3], 2048  }
  0x13   :  { %916 = vsyncadd [#allocation3], 4294965248  ;;  %v922_v0 = vmov 0   ;;  %v43_v1 = vld [vmem:[#allocation2] sm:$0xff]  ;;  %v44_v2 = vld [vmem:[#allocation2 + $0x8] sm:$0xff]  ;;  %v136_v41 = vlaneseq }
  0x14   :  { %866 = vset.pattern.permute.xlu1 %v922_v0  ;;  %865 = vset.pattern.permute.xlu0 %v922_v0  ;;  %v45_v3 = vld [vmem:[#allocation2 + $0x10] sm:$0xff]  ;;  %v966_v4 = vpack.c.bf16 %v44_v2, %v43_v1  ;;  %v46_v5 = vld [vmem:[#allocation2 + $0x18] sm:$0xff]  ;;  %v47_v7 = vld [vmem:[#allocation2 + $0x20] sm:$0xff] }
  0x15   :  { %v968_v6 = vpack.c.bf16 %v46_v5, %v45_v3  ;;  %v48_v8 = vld [vmem:[#allocation2 + $0x28] sm:$0xff]  ;;  %v35_v10 = vld [vmem:[%s1090_s0] sm:$0xff]  ;;  %v49_v12 = vld [vmem:[#allocation2 + $0x30] sm:$0xff]  ;;  %v1030_v42 = vshrl.u32 %v136_v41, 7 }
  0x16   :  { %733 = vmatprep.subr.bf16.mxu0 %v966_v4  ;;  %765 = vmatprep.subr.bf16.mxu1 %v966_v4  ;;  %v976_v9 = vpack.c.bf16 %v48_v8, %v47_v7  ;;  %v37_v11 = vld [vmem:[%s1091_s1] sm:$0xff]  ;;  %v50_v13 = vld [vmem:[#allocation2 + $0x38] sm:$0xff]  ;;  %v42_v16 = vld [vmem:[%s1094_s4 + $0x8] sm:$0xff]  ;;  %v358_v31 = vmul.f32 %v35_v10, %v35_v10 }
  0x17   :  { %735 = vmatpush3.bf16.msra.mxu0 %v966_v4  ;;  %767 = vmatpush3.bf16.msra.mxu1 %v966_v4  ;;  %v41_v14 = vld [vmem:[%s1094_s4] sm:$0xff]  ;;  %v997_v17 = vpack.c.bf16 %v50_v13, %v49_v12  ;;  %v52_v19 = vld [vmem:[#allocation2 + $0x48] sm:$0xff]  ;;  %v53_v22 = vld [vmem:[#allocation2 + $0x50] sm:$0xff]  ;;  %v360_v32 = vmul.f32 %v37_v11, %v37_v11  ;;  %v265_v35 = vmul.f32 %v37_v11, %v35_v10  ;;  %vm138_vm0 = vcmp.lt.s32.totalorder %v1030_v42, 1 }
  0x18   :  { %737 = vmatprep.subr.bf16.mxu0 %v968_v6  ;;  %769 = vmatprep.subr.bf16.mxu1 %v968_v6  ;;  %v39_v15 = vld [vmem:[%s1093_s3] sm:$0xff]  ;;  %v40_v20 = vld [vmem:[%s1093_s3 + $0x8] sm:$0xff]  ;;  %v54_v23 = vld [vmem:[#allocation2 + $0x58] sm:$0xff]  ;;  %vm157_vm1 = vcmp.lt.s32.totalorder %v1030_v42, 7 }
  0x19   :  { %624 = vmatprep.mubr.f32.mxu0 %v35_v10  ;;  %659 = vmatprep.mubr.f32.mxu1 %v37_v11  ;;  %v51_v18 = vld [vmem:[#allocation2 + $0x40] sm:$0xff]  ;;  %v752_v24 = vpack.c.bf16 %v54_v23, %v53_v22  ;;  %v56_v26 = vld [vmem:[#allocation2 + $0x68] sm:$0xff]  ;;  %v57_v28 = vld [vmem:[#allocation2 + $0x70] sm:$0xff]  ;;  %v362_v36 = vadd.f32 %v360_v32, %v358_v31 }
  0x1a   :  { %162 = vperm.xlu1 %866, %v41_v14   ;;  %143 = vperm.xlu0 %865, %v39_v15   ;;  %v748_v21 = vpack.c.bf16 %v52_v19, %v51_v18  ;;  %v55_v25 = vld [vmem:[#allocation2 + $0x60] sm:$0xff]  ;;  %v58_v29 = vld [vmem:[#allocation2 + $0x78] sm:$0xff]  ;;  %v36_v33 = vld [vmem:[%s1090_s0 + $0x8] sm:$0xff]  ;;  %s923_s0 = smov [#allocation5]  }
  0x1b   :  { %739 = vmatpush3.bf16.msra.mxu0 %v968_v6  ;;  %771 = vmatpush3.bf16.msra.mxu1 %v968_v6  ;;  %v756_v27 = vpack.c.bf16 %v56_v26, %v55_v25  ;;  %v760_v30 = vpack.c.bf16 %v58_v29, %v57_v28  ;;  %v38_v34 = vld [vmem:[%s1091_s1 + $0x8] sm:$0xff]  ;;  %v359_v37 = vmul.f32 %v36_v33, %v36_v33  ;;  %s511_s1 = sshll.u32 %s923_s0, 4  ;;  %s512_s1 = int_to_ptr.vmem [resolvable:$true] %s511_s1 }
  0x1c   :  { %741 = vmatprep.subr.bf16.mxu0 %v976_v9  ;;  %773 = vmatprep.subr.bf16.mxu1 %v976_v9  ;;  %v361_v38 = vmul.f32 %v38_v34, %v38_v34  ;;  %v266_v39 = vmul.f32 %v38_v34, %v36_v33  ;;  %s893_s20 = scalar_lea.vmem %s512_s1, 16  ;;  %s897_s21 = scalar_lea.vmem %s512_s1, 32 }
  0x1d   :  { %p894_p8 = scmp.ne.s32.totalorder %s512_s1, %s893_s20  ;;  %p898_p9 = scmp.lt.s32.totalorder %s512_s1, %s512_s1 }
  0x1e   :  { %167 = vperm.xlu1 %866, %v42_v16   ;;  %148 = vperm.xlu0 %865, %v40_v20   ;;  %v363_v40 = vadd.f32 %v361_v38, %v359_v37  ;;  %p899_p10 = scmp.lt.s32.totalorder %s897_s21, %s893_s20 }
  0x1f   :  { %743 = vmatpush3.bf16.msra.mxu0 %v976_v9  ;;  %775 = vmatpush3.bf16.msra.mxu1 %v976_v9 }
  0x20   :  { %745 = vmatprep.subr.bf16.mxu0 %v997_v17  ;;  %777 = vmatprep.subr.bf16.mxu1 %v997_v17  ;;  %p900_p11 = por %p899_p10, %p898_p9 }
  0x22   :  { %p901_p12 = pnand %p900_p11, %p894_p8 }
  0x23   :  { %747 = vmatpush3.bf16.msra.mxu0 %v997_v17  ;;  %779 = vmatpush3.bf16.msra.mxu1 %v997_v17 }
  0x24   :  { %749 = vmatprep.subr.bf16.mxu0 %v748_v21  ;;  %781 = vmatprep.subr.bf16.mxu1 %v748_v21 }
  0x27   :  { %751 = vmatpush3.bf16.msra.mxu0 %v748_v21  ;;  %783 = vmatpush3.bf16.msra.mxu1 %v748_v21 }
  0x28   :  { %753 = vmatprep.subr.bf16.mxu0 %v752_v24  ;;  %785 = vmatprep.subr.bf16.mxu1 %v752_v24 }
  0x2b   :  { %755 = vmatpush3.bf16.msra.mxu0 %v752_v24  ;;  %787 = vmatpush3.bf16.msra.mxu1 %v752_v24 }
  0x2c   :  { %757 = vmatprep.subr.bf16.mxu0 %v756_v27  ;;  %789 = vmatprep.subr.bf16.mxu1 %v756_v27 }
  0x2f   :  { %759 = vmatpush3.bf16.msra.mxu0 %v756_v27  ;;  %791 = vmatpush3.bf16.msra.mxu1 %v756_v27 }
  0x30   :  { %761 = vmatprep.subr.bf16.mxu0 %v760_v30  ;;  %793 = vmatprep.subr.bf16.mxu1 %v760_v30 }
  0x33   :  { %763 = vmatpush3.bf16.msra.mxu0 %v760_v30  ;;  %795 = vmatpush3.bf16.msra.mxu1 %v760_v30 }
  0x34   :  { %797 = vmatprep.subr.bf16.mxu0 %v966_v4  ;;  %829 = vmatprep.subr.bf16.mxu1 %v966_v4 }
  0x36   :  { %625 = vmatmul.mubr.f32.vlgmr.msra.gmra.mrb[0].mxu0 %v36_v33  ;;  %660 = vmatmul.mubr.f32.vlgmr.msra.gmra.mrb[0].mxu1 %v38_v34 }
  0x37   :  { %799 = vmatpush3.bf16.msra.mxu0 %v966_v4  ;;  %831 = vmatpush3.bf16.msra.mxu1 %v966_v4 }
  0x38   :  { %801 = vmatprep.subr.bf16.mxu0 %v968_v6  ;;  %833 = vmatprep.subr.bf16.mxu1 %v968_v6 }
  0x39   :  { %694 = vmatprep.mubr.f32.mxu0 %v265_v35  ;;  %729 = vmatprep.mubr.f32.mxu1 %v362_v36 }
  0x3b   :  { %803 = vmatpush3.bf16.msra.mxu0 %v968_v6  ;;  %835 = vmatpush3.bf16.msra.mxu1 %v968_v6 }
  0x3c   :  { %805 = vmatprep.subr.bf16.mxu0 %v976_v9  ;;  %837 = vmatprep.subr.bf16.mxu1 %v976_v9 }
  0x3f   :  { %807 = vmatpush3.bf16.msra.mxu0 %v976_v9  ;;  %839 = vmatpush3.bf16.msra.mxu1 %v976_v9 }
  0x40   :  { %809 = vmatprep.subr.bf16.mxu0 %v997_v17  ;;  %841 = vmatprep.subr.bf16.mxu1 %v997_v17 }
  0x43   :  { %811 = vmatpush3.bf16.msra.mxu0 %v997_v17  ;;  %843 = vmatpush3.bf16.msra.mxu1 %v997_v17 }
  0x44   :  { %813 = vmatprep.subr.bf16.mxu0 %v748_v21  ;;  %845 = vmatprep.subr.bf16.mxu1 %v748_v21 }
  0x47   :  { %815 = vmatpush3.bf16.msra.mxu0 %v748_v21  ;;  %847 = vmatpush3.bf16.msra.mxu1 %v748_v21 }
  0x48   :  { %817 = vmatprep.subr.bf16.mxu0 %v752_v24  ;;  %849 = vmatprep.subr.bf16.mxu1 %v752_v24 }
  0x4b   :  { %819 = vmatpush3.bf16.msra.mxu0 %v752_v24  ;;  %851 = vmatpush3.bf16.msra.mxu1 %v752_v24 }
  0x4c   :  { %821 = vmatprep.subr.bf16.mxu0 %v756_v27  ;;  %853 = vmatprep.subr.bf16.mxu1 %v756_v27 }
  0x4f   :  { %823 = vmatpush3.bf16.msra.mxu0 %v756_v27  ;;  %855 = vmatpush3.bf16.msra.mxu1 %v756_v27 }
  0x50   :  { %825 = vmatprep.subr.bf16.mxu0 %v760_v30  ;;  %857 = vmatprep.subr.bf16.mxu1 %v760_v30 }
  0x53   :  { %827 = vmatpush3.bf16.msra.mxu0 %v760_v30  ;;  %859 = vmatpush3.bf16.msra.mxu1 %v760_v30 }
  0x56   :  { %695 = vmatmul.mubr.f32.vlgmr.msra.gmra.mrb[2].mxu0 %v266_v39  ;;  %730 = vmatmul.mubr.f32.vlgmr.msra.gmra.mrb[2].mxu1 %v363_v40 }
  0x99   :  { %v1032_v43 = vpop.permute.xlu1 %162  ;;  %v1034_v44 = vpop.permute.xlu0 %143 }
  0x9d   :  { %v149_v0 = vpop.permute.xlu0 %148  ;;  %v168_v8 = vpop.permute.xlu1 %167 }
 0x109   :  { %v626_v45 = vpop.f32.mrb[0].mxu0  ;;  %v661_v46 = vpop.f32.mrb[0].mxu1 }
 0x10a   :  { %v135_v47 = vrot.slane %v626_v45, 7  ;;  %v156_v48 = vrot.slane %v626_v45, 1  ;;  %v250_v49 = vrot.slane %v661_v46, 7  ;;  %v258_v50 = vrot.slane %v661_v46, 1  ;;  %v125_v51 = vpop.f32.mrb[1].mxu0  ;;  %v240_v52 = vpop.f32.mrb[1].mxu1 }
 0x10b   :  { %v134_v53 = vrot.slane %v125_v51, 7  ;;  %v155_v54 = vrot.slane %v125_v51, 1  ;;  %v249_v55 = vrot.slane %v240_v52, 7  ;;  %v257_v56 = vrot.slane %v240_v52, 1 }
 0x10d   :  { %v140_v57 = vsel %vm138_vm0, %v135_v47, %v134_v53  ;;  %v158_v58 = vsel %vm157_vm1, %v155_v54, %v156_v48  ;;  %v252_v59 = vsel %vm138_vm0, %v250_v49, %v249_v55  ;;  %v259_v60 = vsel %vm157_vm1, %v257_v56, %v258_v50 }
 0x10e   :  { %v151_v61 = vmul.f32 %v1034_v44, %v140_v57  ;;  %v170_v62 = vmul.f32 %v1032_v43, %v158_v58  ;;  %v253_v63 = vmul.f32 %v252_v59, %v1034_v44  ;;  %v159_v1 = vsel %vm157_vm1, %v156_v48, %v155_v54 }
 0x10f   :  { %v260_v2 = vsel %vm157_vm1, %v258_v50, %v257_v56  ;;  %v139_v3 = vsel %vm138_vm0, %v134_v53, %v135_v47  ;;  %v251_v4 = vsel %vm138_vm0, %v249_v55, %v250_v49  ;;  %v261_v7 = vmul.f32 %v259_v60, %v1032_v43 }
 0x110   :  { %v153_v5 = vadd.f32 %v151_v61, %v125_v51  ;;  %v255_v6 = vadd.f32 %v253_v63, %v240_v52  ;;  %v171_v9 = vmul.f32 %v168_v8, %v159_v1  ;;  %v152_v10 = vmul.f32 %v149_v0, %v139_v3 }
 0x111   :  { %v254_v11 = vmul.f32 %v251_v4, %v149_v0  ;;  %v262_v14 = vmul.f32 %v260_v2, %v168_v8 }
 0x112   :  { %v172_v12 = vadd.f32 %v170_v62, %v153_v5  ;;  %v263_v13 = vadd.f32 %v261_v7, %v255_v6  ;;  %v154_v15 = vadd.f32 %v626_v45, %v152_v10 }
 0x113   :  { %v256_v16 = vadd.f32 %v661_v46, %v254_v11 }
 0x114   :  { %v457_v17 = vmul.f32 %v172_v12, %v172_v12  ;;  %v455_v18 = vmul.f32 %v263_v13, %v172_v12  ;;  %v459_v19 = vmul.f32 %v263_v13, %v263_v13  ;;  %v173_v20 = vadd.f32 %v171_v9, %v154_v15 }
 0x115   :  { %v264_v21 = vadd.f32 %v262_v14, %v256_v16 }
 0x116   :  { %v461_v22 = vadd.f32 %v459_v19, %v457_v17  ;;  %v458_v24 = vmul.f32 %v173_v20, %v173_v20  ;;  %v463_v1 = vmul.f32 2.0, %v455_v18 }
 0x117   :  { %v456_v23 = vmul.f32 %v264_v21, %v173_v20  ;;  %v460_v25 = vmul.f32 %v264_v21, %v264_v21 }
 0x118   :  { %v465_v11 = vadd.f32 0.0081, %v463_v1  ;;  %v475_v14 = vadd.f32 0.0081, %v461_v22 }
 0x119   :  { %v462_v26 = vadd.f32 %v460_v25, %v458_v24  ;;  %v464_v2 = vmul.f32 2.0, %v456_v23 }
 0x11b   :  { %v476_v13 = vadd.f32 0.0081, %v462_v26 }
 0x129   :  { %v696_v27 = vpop.f32.mrb[2].mxu0  ;;  %v731_v28 = vpop.f32.mrb[2].mxu1 }
 0x12a   :  { %v343_v29 = vrot.slane %v696_v27, 7  ;;  %v351_v30 = vrot.slane %v696_v27, 1  ;;  %v440_v31 = vrot.slane %v731_v28, 7  ;;  %v448_v32 = vrot.slane %v731_v28, 1  ;;  %v333_v33 = vpop.f32.mrb[3].mxu0  ;;  %v430_v34 = vpop.f32.mrb[3].mxu1 }
 0x12b   :  { %v342_v35 = vrot.slane %v333_v33, 7  ;;  %v350_v36 = vrot.slane %v333_v33, 1  ;;  %v439_v37 = vrot.slane %v430_v34, 7  ;;  %v447_v38 = vrot.slane %v430_v34, 1 }
 0x12d   :  { %v344_v39 = vsel %vm138_vm0, %v342_v35, %v343_v29  ;;  %v345_v40 = vsel %vm138_vm0, %v343_v29, %v342_v35  ;;  %v352_v41 = vsel %vm157_vm1, %v350_v36, %v351_v30  ;;  %v353_v45 = vsel %vm157_vm1, %v351_v30, %v350_v36 }
 0x12e   :  { %v346_v46 = vmul.f32 %v345_v40, %v1034_v44  ;;  %v347_v47 = vmul.f32 %v344_v39, %v149_v0  ;;  %v354_v48 = vmul.f32 %v352_v41, %v1032_v43  ;;  %v355_v49 = vmul.f32 %v353_v45, %v168_v8 }
 0x12f   :  { %v441_v50 = vsel %vm138_vm0, %v439_v37, %v440_v31  ;;  %v442_v51 = vsel %vm138_vm0, %v440_v31, %v439_v37  ;;  %v449_v52 = vsel %vm157_vm1, %v447_v38, %v448_v32  ;;  %v450_v53 = vsel %vm157_vm1, %v448_v32, %v447_v38 }
 0x130   :  { %v348_v54 = vadd.f32 %v346_v46, %v333_v33  ;;  %v349_v55 = vadd.f32 %v696_v27, %v347_v47  ;;  %v443_v56 = vmul.f32 %v442_v51, %v1034_v44  ;;  %v444_v57 = vmul.f32 %v441_v50, %v149_v0 }
 0x131   :  { %v451_v58 = vmul.f32 %v449_v52, %v1032_v43  ;;  %v452_v59 = vmul.f32 %v450_v53, %v168_v8  ;;  %v466_v44 = vadd.f32 0.0081, %v464_v2 }
 0x132   :  { %v356_v60 = vadd.f32 %v354_v48, %v348_v54  ;;  %v357_v61 = vadd.f32 %v355_v49, %v349_v55  ;;  %v445_v62 = vadd.f32 %v443_v56, %v430_v34  ;;  %v446_v63 = vadd.f32 %v731_v28, %v444_v57 }
 0x134   :  { %v467_v3 = vmul.f32 18.0, %v356_v60  ;;  %v468_v4 = vmul.f32 18.0, %v357_v61  ;;  %v453_v5 = vadd.f32 %v451_v58, %v445_v62  ;;  %v454_v6 = vadd.f32 %v452_v59, %v446_v63 }
 0x136   :  { %v469_v42 = vsub.f32 %v467_v3, %v463_v1  ;;  %v470_v7 = vsub.f32 %v468_v4, %v464_v2  ;;  %v477_v9 = vmul.f32 9.0, %v453_v5  ;;  %v478_v10 = vmul.f32 9.0, %v454_v6 }
 0x138   :  { %v471_v0 = vadd.f32 0.0729, %v469_v42  ;;  %v472_v12 = vadd.f32 0.0729, %v470_v7  ;;  %v479_v43 = vsub.f32 %v477_v9, %v461_v22  ;;  %v480_v8 = vsub.f32 %v478_v10, %v462_v26 }
 0x13a   :  { %v473_v15 = vmul.f32 %v471_v0, %v465_v11  ;;  %v474_v16 = vmul.f32 %v472_v12, %v466_v44  ;;  %v481_v17 = vadd.f32 0.0729, %v479_v43  ;;  %v482_v18 = vadd.f32 0.0729, %v480_v8 }
 0x13c   :  { %v483_v19 = vmul.f32 %v481_v17, %v475_v14  ;;  %v484_v20 = vmul.f32 %v482_v18, %v476_v13  ;;  %v485_v21 = vmul.f32 0.5, %v473_v15  ;;  %v486_v24 = vmul.f32 0.5, %v474_v16 }
 0x13e   :  { %867 = vrcp.f32 %v483_v19 }
 0x13f   :  { %869 = vrcp.f32 %v484_v20 }
 0x148   :  { %v868_v23 = vpop.eup %867 }
 0x149   :  { %v870_v25 = vpop.eup %869  ;;  %v489_v27 = vmul.f32 %v868_v23, %v485_v21 }
 0x14a   :  { %v490_v28 = vmul.f32 %v870_v25, %v486_v24 }
 0x14b   :  { %v491_v29 = vsub.f32 0.5, %v489_v27 }
 0x14c   :  { %v492_v30 = vsub.f32 0.5, %v490_v28 }
 0x14d   :  { %v493_v31 = vmax.f32 %v491_v29, 0.0 }
 0x14e   :  { %v494_v32 = vmax.f32 %v492_v30, 0.0 }
 0x14f   :  { %v495_v26 = vmin.f32 %v493_v31, 1.0 }
 0x150   :  { %v496_v22 = vmin.f32 %v494_v32, 1.0 }
 0x152   :  { %v497_v33 = vadd.f32 %v496_v22, %v495_v26 }
 0x154   :  { %v498_v34 = vrot.slane %v497_v33, 4 }
 0x156   :  { %v499_v35 = vadd.f32 %v498_v34, %v497_v33 }
 0x158   :  { %v500_v36 = vrot.slane %v499_v35, 2 }
 0x15a   :  { %v501_v37 = vadd.f32 %v500_v36, %v499_v35 }
 0x15c   :  { %v502_v38 = vrot.slane %v501_v37, 1 }
 0x15e   :  { %v503_v39 = vadd.f32 %v502_v38, %v501_v37 }
 0x160   :  { %504 = vst [vmem:[#allocation5] sm:$0x1] %v503_v39 }
 0x161   :  { %904 = shalt.err (!%p901_p12)
}
 0x162   :  { %s905_s24 = scalar_lea.hbm %s1095_s5, 16 }
 0x163   :  { %p906_p13 = scmp.ne.s32.totalorder %s1095_s5, %s905_s24  ;;  %p909_p0 = scmp.lt.u32.totalorder %s905_s24, %s1095_s5 }
 0x165   :  { %p911_p1 = pnand %p909_p0, %p906_p13 }
 0x167   :  { %914 = shalt.err (!%p911_p1)
}
 0x168   :  { %514 = dma.vmem_to_hbm [thread:$0]  %s512_s1, 16, %s1095_s5, [#allocation4]  }
 0x169   :  { %917 = dma.done.wait [#allocation4], 16  }
 0x16a   :  { %918 = vsyncadd [#allocation4], 4294967280 }
 0x16b   :  { %518 = vsyncpa [#allocation3], 1 }
 0x16c   :  { %519 = vsyncpa [#allocation4], 1 }

</bundles_post_ra>
